<compile_context>
chip_gen: v6e
topology: v6e:2x2x1
jax: 0.10.0
libtpu: 0.0.40
codegen_flags: <defaults>
</compile_context>

<pallas_src>
import functools

import jax
import jax.numpy as jnp
from jax.experimental import pallas as pl
from jax.experimental.pallas import tpu as pltpu


def _cdiv(a, b):
    return -(-a // b)


def _round_up(a, b):
    return _cdiv(a, b) * b


def _dist_ln_kernel(*refs, eps, chunk_widths):
    """refs = (x_0..x_{n-1}, gamma_(1,H), beta_(1,H), out_(TR,H))."""
    n = len(chunk_widths)
    x_refs = refs[:n]
    g_ref = refs[n]
    b_ref = refs[n + 1]
    o_ref = refs[n + 2]

    inv_h = 1.0 / float(sum(chunk_widths))

    # ---- Pass 1: global per-row moments from per-chunk partial sums. ----
    # Row sums are done on the MXU (dot with a ones column) so the VPU/XLU
    # stay free and the raw-dtype chunk is consumed without an f32 cast.
    # Accumulation stays in f32 via preferred_element_type.
    in_dtype = x_refs[0].dtype
    ones_by_w = {hc: jnp.ones((hc, 1), dtype=in_dtype)
                 for hc in set(chunk_widths)}
    sum_x = None
    sum_x2 = None
    for xr, hc in zip(x_refs, chunk_widths):
        x = xr[...]                                  # raw dtype, no cast here
        ones = ones_by_w[hc]
        s = jnp.dot(x, ones, preferred_element_type=jnp.float32)      # (TR,1)
        s2 = jnp.dot(x * x, ones, preferred_element_type=jnp.float32)
        sum_x = s if sum_x is None else sum_x + s
        sum_x2 = s2 if sum_x2 is None else sum_x2 + s2

    mean = sum_x * inv_h                             # E[x]      (TR, 1)
    var = sum_x2 * inv_h - mean * mean               # biased var (module parity)
    inv_std = jax.lax.rsqrt(var + eps)               # EUP rsqrt on a column

    # ---- Pass 2: normalize each chunk, store into its static output slice. ----
    off = 0
    for xr, hc in zip(x_refs, chunk_widths):
        x = xr[...].astype(jnp.float32)              # single f32 cast per chunk
        g = g_ref[:, off:off + hc].astype(jnp.float32)
        b = b_ref[:, off:off + hc].astype(jnp.float32)
        y = (x - mean) * inv_std * g + b
        o_ref[:, off:off + hc] = y.astype(o_ref.dtype)
        off += hc


def _vmem_budgets():
    """(blockspec_budget_bytes, vmem_limit_bytes) per TPU generation."""
    cap = 64 * 1024 * 1024
    try:
        info = pltpu.get_tpu_info()
        cap = int(getattr(info, "vmem_capacity_bytes", cap))
    except Exception:
        pass
    if cap <= 64 * 1024 * 1024:
        # v7x: 64 MiB/TC -> tighter, f32-temp-aware tiling budget.
        return 28 * 1024 * 1024, 48 * 1024 * 1024
    # v5e / v6e: 128 MiB physical VMEM -> bigger tiles, fewer grid steps.
    return 64 * 1024 * 1024, 100 * 1024 * 1024


def _choose_row_tile(num_rows, hidden, itemsize, budget_bytes):
    """Row-tile TR: dtype-aware sublane grain, temp-aware VMEM cap, even tiles."""
    grain = {4: 8, 2: 16, 1: 32}.get(int(itemsize), 8)

    # Per-row VMEM footprint: double-buffered input blocks (sum of chunk
    # widths = H per row) + double-buffered output block + ~3 rows of f32
    # in-kernel temps (casted chunk / x_hat / y before each per-chunk store).
    per_row = 4 * hidden * int(itemsize) + 3 * hidden * 4
    cap = max(grain, (budget_bytes // per_row) // grain * grain)

    r_grain = _round_up(num_rows, grain)
    tr = min(cap, r_grain)
    n_tiles = _cdiv(num_rows, tr)

    # Prefer an even number of grid steps so the "parallel" row axis
    # load-balances across v7x's two TensorCores.
    if n_tiles % 2 == 1 and r_grain >= 2 * grain:
        n_even = n_tiles + 1
        tr_even = max(grain, _round_up(_cdiv(num_rows, n_even), grain))
        if _cdiv(num_rows, tr_even) % 2 == 0:
            tr = tr_even
    return tr


def distributed_layernorm(xs, gammas, betas, epsilon=1e-5):
    """Pallas implementation of PytorchDistributedLayernorm.forward.

    xs:      list of arrays, each [B, S, Hc_i]
    gammas:  list of arrays, each broadcastable to [Hc_i]
    betas:   list of arrays, each broadcastable to [Hc_i]
    returns: [B, S, H] with H = sum(Hc_i) (same as torch.cat(ys, dim=-1))
    """
    B, S = int(xs[0].shape[0]), int(xs[0].shape[1])
    R = B * S
    chunk_widths = [int(x.shape[-1]) for x in xs]
    H = sum(chunk_widths)
    dtype = xs[0].dtype
    itemsize = jnp.dtype(dtype).itemsize

    # Lane-dense gamma/beta: a single (1, H) array each (tiny), sliced
    # statically per chunk inside the kernel.
    g_cat = jnp.concatenate(
        [jnp.reshape(g, (1, hc)) for g, hc in zip(gammas, chunk_widths)], axis=-1)
    b_cat = jnp.concatenate(
        [jnp.reshape(b, (1, hc)) for b, hc in zip(betas, chunk_widths)], axis=-1)

    # Lane-sparse guard: sub-128 chunk widths waste vreg lanes and force
    # masked stores; fall back to one lane-dense (R, H) input in that case.
    lane_dense = all(hc % 128 == 0 for hc in chunk_widths)
    if lane_dense:
        xs_in = [x.reshape(R, hc) for x, hc in zip(xs, chunk_widths)]
        widths = tuple(chunk_widths)
    else:
        xs_in = [jnp.concatenate(
            [x.reshape(R, hc) for x, hc in zip(xs, chunk_widths)], axis=-1)]
        widths = (H,)

    budget, vmem_limit = _vmem_budgets()
    TR = _choose_row_tile(R, H, itemsize, budget)
    n_tiles = _cdiv(R, TR)

    x_specs = [pl.BlockSpec((TR, hc), lambda r: (r, 0)) for hc in widths]
    gb_spec = pl.BlockSpec((1, H), lambda r: (0, 0))

    out = pl.pallas_call(
        functools.partial(_dist_ln_kernel, eps=float(epsilon),
                          chunk_widths=widths),
        out_shape=jax.ShapeDtypeStruct((R, H), dtype),
        grid_spec=pltpu.PrefetchScalarGridSpec(
            num_scalar_prefetch=0,
            grid=(n_tiles,),
            in_specs=x_specs + [gb_spec, gb_spec],
            out_specs=pl.BlockSpec((TR, H), lambda r: (r, 0)),
        ),
        compiler_params=pltpu.CompilerParams(
            dimension_semantics=("parallel",),
            vmem_limit_bytes=vmem_limit,
        ),
    )(*xs_in, g_cat, b_cat)

    return out.reshape(B, S, H)


def _reference(xs, gammas, betas, epsilon=1e-5):
    """Pure-JAX transliteration of the PyTorch forward (chunk-wise moments)."""
    num_chunks = len(xs)
    counts, meanxs, meanx2s = [], [], []
    for chunk in xs:
        c = chunk.shape[-1]
        counts.append(float(c))
        meanxs.append(jnp.mean(chunk, axis=-1, keepdims=True))
        meanx2s.append(jnp.mean(jnp.square(chunk), axis=-1, keepdims=True))
    count = sum(counts)
    meanxs = [meanxs[i] * counts[i] for i in range(num_chunks)]
    meanx2s = [meanx2s[i] * counts[i] for i in range(num_chunks)]
    mean = sum(meanxs) / count
    meanx2 = sum(meanx2s) / count
    var = meanx2 - jnp.square(mean)
    ys = []
    for i in range(num_chunks):
        x_hat = (xs[i] - mean) / jnp.sqrt(var + epsilon)
        ys.append(gammas[i] * x_hat + betas[i])
    return jnp.concatenate(ys, axis=-1)


def _run_case(key, B, S, num_chunks, hc, eps):
    keys = jax.random.split(key, 3 * num_chunks)
    xs = [jax.random.normal(keys[i], (B, S, hc), dtype=jnp.float32)
          for i in range(num_chunks)]
    gammas = [1.0 + 0.1 * jax.random.normal(keys[num_chunks + i], (1, 1, hc),
                                            dtype=jnp.float32)
              for i in range(num_chunks)]
    betas = [0.1 * jax.random.normal(keys[2 * num_chunks + i], (1, 1, hc),
                                     dtype=jnp.float32)
             for i in range(num_chunks)]

    y = jax.block_until_ready(distributed_layernorm(xs, gammas, betas, epsilon=eps))
    y_ref = _reference(xs, gammas, betas, epsilon=eps)
    assert y.shape == (B, S, num_chunks * hc)
    assert jnp.allclose(y, y_ref, atol=1e-5, rtol=1e-5), "mismatch vs reference"


if __name__ == "__main__":
    EPS = 1e-5
    key = jax.random.PRNGKey(0)
    k1, k2 = jax.random.split(key)

    # Case 1: the original unit-test shape (4 "devices", Hc=32 -> H=128).
    # Exercises the lane-dense fallback path (Hc % 128 != 0).
    _run_case(k1, B=2, S=8, num_chunks=4, hc=32, eps=EPS)

    # Case 2: small version of the production layout (Hc multiple of 128)
    # exercising the per-chunk BlockSpec path with direct slice stores.
    _run_case(k2, B=2, S=8, num_chunks=2, hc=128, eps=EPS)

    print("KERNEL_OK")
</pallas_src>

<mosaic_0001>
module attributes {stable_mosaic.version = 11 : i64} {
  func.func @_dist_ln_kernel(%arg0: i32, %arg1: memref<8x128xf32, #tpu.memory_space<vmem>>, %arg2: memref<1x128xf32, #tpu.memory_space<vmem>>, %arg3: memref<1x128xf32, #tpu.memory_space<vmem>>, %arg4: memref<8x128xf32, #tpu.memory_space<vmem>>) attributes {dimension_semantics = [#tpu.dimension_semantics<parallel>], iteration_bounds = array<i64: 2>, scalar_prefetch = 0 : i64, scratch_operands = 0 : i64, tpu.core_type = #tpu.core_type<tc>, window_params = [{transform_indices = @transform_0, window_bounds = array<i64: 8, 128>}, {pipeline_mode = #tpu.pipeline_mode<synchronous>, transform_indices = @transform_1, window_bounds = array<i64: 1, 128>}, {pipeline_mode = #tpu.pipeline_mode<synchronous>, transform_indices = @transform_2, window_bounds = array<i64: 1, 128>}, {transform_indices = @transform_3, window_bounds = array<i64: 8, 128>}]} {
    %cst = arith.constant 1.000000e+00 : f32
    %0 = vector.broadcast %cst : f32 to vector<128x1xf32>
    %c0 = arith.constant 0 : index
    %c0_0 = arith.constant 0 : index
    %1 = vector.load %arg1[%c0, %c0_0] : memref<8x128xf32, #tpu.memory_space<vmem>>, vector<8x128xf32>
    %cst_1 = arith.constant dense<0.000000e+00> : vector<8x1xf32>
    %2 = tpu.matmul %1, %0, %cst_1 {dimension_numbers = #tpu.dot_dimension_numbers<[1], [0], [0], [1], [0, 0, 1, 1], [], []>} : vector<8x128xf32>, vector<128x1xf32>, vector<8x1xf32> -> vector<8x1xf32>
    %3 = arith.mulf %1, %1 : vector<8x128xf32>
    %cst_2 = arith.constant dense<0.000000e+00> : vector<8x1xf32>
    %4 = tpu.matmul %3, %0, %cst_2 {dimension_numbers = #tpu.dot_dimension_numbers<[1], [0], [0], [1], [0, 0, 1, 1], [], []>} : vector<8x128xf32>, vector<128x1xf32>, vector<8x1xf32> -> vector<8x1xf32>
    %cst_3 = arith.constant 7.812500e-03 : f32
    %5 = vector.broadcast %cst_3 : f32 to vector<8x1xf32>
    %6 = arith.mulf %2, %5 : vector<8x1xf32>
    %cst_4 = arith.constant 7.812500e-03 : f32
    %7 = vector.broadcast %cst_4 : f32 to vector<8x1xf32>
    %8 = arith.mulf %4, %7 : vector<8x1xf32>
    %9 = arith.mulf %6, %6 : vector<8x1xf32>
    %10 = arith.subf %8, %9 : vector<8x1xf32>
    %cst_5 = arith.constant 9.99999974E-6 : f32
    %11 = vector.broadcast %cst_5 : f32 to vector<8x1xf32>
    %12 = arith.addf %10, %11 : vector<8x1xf32>
    %13 = math.rsqrt %12 : vector<8x1xf32>
    %c0_6 = arith.constant 0 : index
    %c0_7 = arith.constant 0 : index
    %14 = vector.load %arg1[%c0_6, %c0_7] : memref<8x128xf32, #tpu.memory_space<vmem>>, vector<8x128xf32>
    %c0_8 = arith.constant 0 : index
    %c0_9 = arith.constant 0 : index
    %15 = vector.load %arg2[%c0_8, %c0_9] : memref<1x128xf32, #tpu.memory_space<vmem>>, vector<1x128xf32>
    %c0_10 = arith.constant 0 : index
    %c0_11 = arith.constant 0 : index
    %16 = vector.load %arg3[%c0_10, %c0_11] : memref<1x128xf32, #tpu.memory_space<vmem>>, vector<1x128xf32>
    %17 = vector.broadcast %6 : vector<8x1xf32> to vector<8x128xf32>
    %18 = arith.subf %14, %17 : vector<8x128xf32>
    %19 = vector.broadcast %13 : vector<8x1xf32> to vector<8x128xf32>
    %20 = arith.mulf %18, %19 : vector<8x128xf32>
    %21 = vector.broadcast %15 : vector<1x128xf32> to vector<8x128xf32>
    %22 = arith.mulf %20, %21 : vector<8x128xf32>
    %23 = vector.broadcast %16 : vector<1x128xf32> to vector<8x128xf32>
    %24 = arith.addf %22, %23 : vector<8x128xf32>
    %c0_12 = arith.constant 0 : index
    %c0_13 = arith.constant 0 : index
    %25 = vector.load %arg4[%c0_12, %c0_13] : memref<8x128xf32, #tpu.memory_space<vmem>>, vector<8x128xf32>
    tpu.vector_store %arg4[%c0_12, %c0_13], %24 {strides = array<i32>} : memref<8x128xf32, #tpu.memory_space<vmem>>, vector<8x128xf32>,
    return
  }
  func.func @transform_0(%arg0: i32) -> (i32, i32) {
    %c0_i32 = arith.constant 0 : i32
    %c0_i32_0 = arith.constant 0 : i32
    return %arg0, %c0_i32 : i32, i32
  }
  func.func @transform_1(%arg0: i32) -> (i32, i32) {
    %c0_i32 = arith.constant 0 : i32
    %c0_i32_0 = arith.constant 0 : i32
    %c0_i32_1 = arith.constant 0 : i32
    return %c0_i32, %c0_i32_0 : i32, i32
  }
  func.func @transform_2(%arg0: i32) -> (i32, i32) {
    %c0_i32 = arith.constant 0 : i32
    %c0_i32_0 = arith.constant 0 : i32
    %c0_i32_1 = arith.constant 0 : i32
    return %c0_i32, %c0_i32_0 : i32, i32
  }
  func.func @transform_3(%arg0: i32) -> (i32, i32) {
    %c0_i32 = arith.constant 0 : i32
    %c0_i32_0 = arith.constant 0 : i32
    return %arg0, %c0_i32 : i32, i32
  }
}

</mosaic_0001>

<bundles_post_ra>
// kernel: tpu_custom_call.1
= control target key start
LH: loop header
LB: loop body
LE: loop exit
PB: predicated region body
PF: predicated region fallthrough
CT: control target
= control target key end

     0   :  { %8 = vsyncpa [#allocation3], 0  ;;  %s958_s0 = inlined_call_operand.hbm [shape: f32[16,128], index: 0, kind: input, shape index: {}]   ;;  %s959_s1 = inlined_call_operand.vmem [shape: f32[1,128], index: 1, kind: input, shape index: {}]   ;;  %s960_s2 = inlined_call_operand.vmem [shape: f32[1,128], index: 2, kind: input, shape index: {}]   ;;  %s961_s3 = inlined_call_operand.hbm [shape: f32[16,128], index: 3, kind: output, shape index: {}]  }
   0x1   :  { %10 = vsyncpa [#allocation3 + $0x1], 0 }
   0x2   :  { %11 = vsyncpa [#allocation4], 0 }
   0x3   :  { %13 = vsyncpa [#allocation4 + $0x1], 0  ;;  %s738_s12 = smov 0   ;;  %s740_s13 = smov 0  }
   0x4   :  { %s742_s14 = smov 0   ;;  %s744_s15 = smov 0  }
   0x5 LB: > { %s759_s16 = sadd.s32 4294967295, %s710_s15   ;;  %s447_s17 = sadd.s32 4294967294, %s710_s15   ;;  %s710_s15 = sphi %s744_s15, %s978_s15   ;;  %s706_s14 = sphi %s742_s14, %s977_s14   ;;  %s702_s13 = sphi %s740_s13, %s976_s13   ;;  %s698_s12 = sphi %s738_s12, %s975_s12  }
   0x6   : > { %s763_s18 = sadd.s32 1, %s710_s15   ;;  %s26_s19 = sadd.s32 1, %s706_s14 }
   0x7   : > { %s23_s20 = ssub.s32 %s710_s15, %s763_s18  ;;  %p33_p0 = scmp.ne.s32.totalorder %s706_s14, %s702_s13 }
   0x8   : > { %p24_p1 = scmp.eq.s32.totalorder %s23_s20, 0  ;;  %p34_p2 = scmp.eq.s32.totalorder %s710_s15, 0 }
   0x9   : > { %p39_p3 = scmp.ne.s32.totalorder %s702_s13, %s698_s12  ;;  %p40_p4 = scmp.eq.s32.totalorder %s759_s16, 0 }
   0xa   : > { %s775_s21 = scalar_select %p24_p1, %s706_s14, %s26_s19  }
   0xb   : > { %p777_p5 = por %p34_p2, %p33_p0  ;;  %p781_p6 = por %p40_p4, %p39_p3 }
   0xc   : > { %p105_p7 = scmp.eq.s32.totalorder %s759_s16, 1  ;;  %p111_p8 = scmp.eq.s32.totalorder %s447_s17, 1 }
   0xd   : > { %s965_s23 = scalar_select %p781_p6, 1, 0 }
   0xe   : > { %p577_p10 = scmp.lt.s32.totalorder %s710_s15, 2  ;;  %p788_p11 = por %p105_p7, %p33_p0 }
   0xf   : > { %p792_p12 = por %p111_p8, %p39_p3  ;;  %s137_s26 = sand.u32 1, %s706_s14  }
  0x10   : > { %s966_s24 = scalar_select %p788_p11, 1, 0 }
  0x11   : > { %s967_s25 = scalar_select %p792_p12, 1, 0 }
  0x12   : > { %s451_s27 = sshll.u32 %s710_s15, 7  ;;  %s450_s28 = sshll.u32 %s137_s26, 3 }
  0x13   : > { %s801_s4 = scalar_lea.hbm %s958_s0, %s451_s27  ;;  %s141_s5 = scalar_lea.vmem [#allocation2], %s450_s28 }
  0x14   : > { %s148_s6 = sshll.u32 %s141_s5, 4  ;;  %p805_p13 = pnand %p577_p10, %p777_p5  ;;  %s809_s6 = int_to_ptr.vmem [resolvable:$true] %s148_s6 }
  0x15   : > { %s138_s8 = scalar_lea.sflag [#allocation3], %s137_s26  ;;  %s618_s9 = scalar_lea.hbm %s801_s4, 128 }
  0x16   : > { %p619_p2 = scmp.ne.s32.totalorder %s801_s4, %s618_s9  ;;  %p620_p3 = pneg %p805_p13 }
  0x17   : > { %s623_s17 = scalar_lea.hbm %s958_s0, 256  ;;  %p624_p5 = scmp.lt.s32.totalorder %s801_s4, %s958_s0 }
  0x18   : > { %p621_p4 = pnand %p620_p3, %p619_p2  ;;  %p625_p8 = scmp.lt.s32.totalorder %s623_s17, %s618_s9 }
  0x1a   : > { %p622_p7 = pneg %p621_p4  ;;  %p626_p10 = por %p625_p8, %p624_p5 }
  0x1c   : > { %p627_p9 = pnand %p626_p10, %p622_p7 }
  0x1e   : > { %630 = shalt.err (!%p627_p9)
}
  0x1f   : > { %s631_s22 = scalar_lea.vmem %s809_s6, 128  ;;  %s712_s26 = smov [#allocation2]  }
  0x20   : > { %p632_p0 = scmp.ne.s32.totalorder %s809_s6, %s631_s22  ;;  %s636_s27 = sshll.u32 %s712_s26, 4  ;;  %s637_s27 = int_to_ptr.vmem [resolvable:$false] %s636_s27 }
  0x21   : > { %s638_s28 = scalar_lea.vmem %s637_s27, 256  ;;  %p639_p4 = scmp.lt.s32.totalorder %s809_s6, %s637_s27 }
  0x22   : > { %p634_p1 = pnand %p632_p0, %p620_p3  ;;  %p640_p12 = scmp.lt.s32.totalorder %s638_s28, %s631_s22 }
  0x24   : > { %p635_p2 = pneg %p634_p1  ;;  %p641_p11 = por %p640_p12, %p639_p4 }
  0x26   : > { %p642_p6 = pnand %p641_p11, %p635_p2 }
  0x28   : > { %645 = shalt.err (!%p642_p6)
}
  0x29   : > { %572 = dma.hbm_to_vmem [thread:$0]  (!%p805_p13), %s801_s4, 128, %s809_s6, %s138_s8  }
  0x2a   : > { %p969_p9 = scmp.lt.s32.totalorder %s710_s15, 3  ;;  %p970_p7 = scmp.ge.s32.totalorder %s710_s15, 1 }
  0x2c   : > { %p154_p0 = pnand %p970_p7, %p969_p9 }
  0x2d   : > { %s836_s29 = sand.u32 (!%p154_p0), 1, %s702_s13   ;;  %p971_p6 = scmp.ne.s32.totalorder (!%p154_p0), %s965_s23, 0 }
  0x2e   : > { %157 = sbr.rel (%p154_p0) target bundleno = 444 (0x1bc), region = 32  ;;  %s453_s30 = sshll.u32 (!%p154_p0), %s836_s29, 3 }
  0x2f   : > { %s160_s5 = scalar_lea.sflag (!%p154_p0), [#allocation3], %s836_s29  ;;  %s842_s7 = scalar_lea.vmem (!%p154_p0), [#allocation2], %s453_s30 }
  0x33   : > { %689 = dma.done.wait (%p971_p6), %s160_s5, 128  }
  0x34   : > { %691 = vsyncadd (%p971_p6), %s160_s5, 4294967168  ;;  %v713_v0 = vmov 0.0   ;;  %v714_v1 = vmov 1.0   ;;  %v186_v2 = vld [vmem:[%s842_s7] sm:$0xff]  ;;  %vm715_vm0 = vmmov 0   ;;  %v716_v4 = vmov 0  }
  0x35   : > { %495 = vmatprep.subr.mxu0 %v713_v0  ;;  %530 = vmatprep.subr.mxu1 %v713_v0  ;;  %v257_v3 = vmul.f32 %v186_v2, %v186_v2  ;;  %v455_v17 = vld [vmem:[%s959_s1] ss:$0 sm:$0xff]  ;;  %s458_s9 = sshll.u32 %s759_s16, 7  ;;  %s185_s10 = scalar_lea.vmem [#allocation5], %s453_s30 }
  0x36   : > { %496 = vmatpush3.msra.mxu0 %v714_v1  ;;  %531 = vmatpush3.msra.mxu1 %v714_v1  ;;  %v456_v20 = vld [vmem:[%s960_s2] ss:$0 sm:$0xff]  ;;  %s377_s11 = sshll.u32 %s185_s10, 4  ;;  %s375_s20 = scalar_lea.hbm %s961_s3, %s458_s9  ;;  %s378_s11 = int_to_ptr.vmem [resolvable:$true] %s377_s11 }
  0x37   : > { %497 = vmatprep.subr.mxu0 %v713_v0  ;;  %532 = vmatprep.subr.mxu1 %v713_v0  ;;  %s364_s22 = scalar_lea.sflag [#allocation4], %s836_s29  ;;  %s646_s26 = scalar_lea.vmem %s378_s11, 128 }
  0x38   : > { %498 = vmatpush3.msra.mxu0 %v714_v1  ;;  %533 = vmatpush3.msra.mxu1 %v714_v1  ;;  %p647_p11 = scmp.ne.s32.totalorder %s378_s11, %s646_s26  ;;  %p972_p12 = scmp.ne.s32.totalorder %s966_s24, 0 }
  0x39   : > { %499 = vmatprep.subr.mxu0 %v713_v0  ;;  %534 = vmatprep.subr.mxu1 %v713_v0  ;;  %s717_s27 = smov [#allocation5]  }
  0x3a   : > { %500 = vmatpush3.msra.mxu0 %v714_v1  ;;  %535 = vmatpush3.msra.mxu1 %v714_v1  ;;  %p648_p13 = pnand %p647_p11, %p972_p12  ;;  %s650_s28 = sshll.u32 %s717_s27, 4  ;;  %s651_s28 = int_to_ptr.vmem [resolvable:$false] %s650_s28 }
  0x3b   : > { %501 = vmatprep.subr.mxu0 %v713_v0  ;;  %536 = vmatprep.subr.mxu1 %v713_v0  ;;  %s652_s16 = scalar_lea.vmem %s651_s28, 256  ;;  %p653_p3 = scmp.lt.s32.totalorder %s378_s11, %s651_s28 }
  0x3c   : > { %502 = vmatpush3.msra.mxu0 %v714_v1  ;;  %537 = vmatpush3.msra.mxu1 %v714_v1  ;;  %p649_p1 = pneg %p648_p13  ;;  %p654_p5 = scmp.lt.s32.totalorder %s652_s16, %s646_s26 }
  0x3d   : > { %503 = vmatprep.subr.mxu0 %v713_v0  ;;  %538 = vmatprep.subr.mxu1 %v713_v0 }
  0x3e   : > { %504 = vmatpush3.msra.mxu0 %v714_v1  ;;  %539 = vmatpush3.msra.mxu1 %v714_v1  ;;  %p655_p8 = por %p654_p5, %p653_p3 }
  0x3f   : > { %505 = vmatprep.subr.mxu0 %v713_v0  ;;  %540 = vmatprep.subr.mxu1 %v713_v0 }
  0x40   : > { %506 = vmatpush3.msra.mxu0 %v714_v1  ;;  %541 = vmatpush3.msra.mxu1 %v714_v1  ;;  %p656_p10 = pnand %p655_p8, %p649_p1 }
  0x41   : > { %507 = vmatprep.subr.mxu0 %v713_v0  ;;  %542 = vmatprep.subr.mxu1 %v713_v0 }
  0x42   : > { %508 = vmatpush3.msra.mxu0 %v714_v1  ;;  %543 = vmatpush3.msra.mxu1 %v714_v1 }
  0x43   : > { %509 = vmatprep.subr.mxu0 %v713_v0  ;;  %544 = vmatprep.subr.mxu1 %v713_v0 }
  0x44   : > { %510 = vmatpush3.msra.mxu0 %v714_v1  ;;  %545 = vmatpush3.msra.mxu1 %v714_v1 }
  0x45   : > { %511 = vmatprep.subr.mxu0 %v713_v0  ;;  %546 = vmatprep.subr.mxu1 %v713_v0 }
  0x46   : > { %512 = vmatpush3.msra.mxu0 %v714_v1  ;;  %547 = vmatpush3.msra.mxu1 %v714_v1 }
  0x47   : > { %513 = vmatprep.subr.mxu0 %v713_v0  ;;  %548 = vmatprep.subr.mxu1 %v713_v0 }
  0x48   : > { %514 = vmatpush3.msra.mxu0 %v714_v1  ;;  %549 = vmatpush3.msra.mxu1 %v714_v1 }
  0x49   : > { %515 = vmatprep.subr.mxu0 %v713_v0  ;;  %550 = vmatprep.subr.mxu1 %v713_v0 }
  0x4a   : > { %516 = vmatpush3.msra.mxu0 %v714_v1  ;;  %551 = vmatpush3.msra.mxu1 %v714_v1 }
  0x4b   : > { %517 = vmatprep.subr.mxu0 %v713_v0  ;;  %552 = vmatprep.subr.mxu1 %v713_v0 }
  0x4c   : > { %518 = vmatpush3.msra.mxu0 %v714_v1  ;;  %553 = vmatpush3.msra.mxu1 %v714_v1 }
  0x4d   : > { %519 = vmatprep.subr.mxu0 %v713_v0  ;;  %554 = vmatprep.subr.mxu1 %v713_v0 }
  0x4e   : > { %520 = vmatpush3.msra.mxu0 %v714_v1  ;;  %555 = vmatpush3.msra.mxu1 %v714_v1 }
  0x4f   : > { %521 = vmatprep.subr.mxu0 %v713_v0  ;;  %556 = vmatprep.subr.mxu1 %v713_v0 }
  0x50   : > { %522 = vmatpush3.msra.mxu0 %v714_v1  ;;  %557 = vmatpush3.msra.mxu1 %v714_v1 }
  0x51   : > { %523 = vmatprep.subr.mxu0 %v713_v0  ;;  %558 = vmatprep.subr.mxu1 %v713_v0 }
  0x52   : > { %524 = vmatpush3.msra.mxu0 %v714_v1  ;;  %559 = vmatpush3.msra.mxu1 %v714_v1 }
  0x53   : > { %525 = vmatprep.subr.mxu0 %v713_v0  ;;  %560 = vmatprep.subr.mxu1 %v713_v0 }
  0x54   : > { %526 = vmatpush3.msra.mxu0 %v714_v1  ;;  %527 = vmatprep.mubr.msk.f32.mxu0 %vm715_vm0, %v713_v0 }
  0x55   : > { %561 = vmatpush3.msra.mxu1 %v714_v1  ;;  %562 = vmatprep.mubr.msk.f32.mxu1 %vm715_vm0, %v713_v0 }
  0x56   : > { %528 = vmatmul.mubr.f32.vlgmr.msra.gmra.mxu0 %v186_v2  ;;  %563 = vmatmul.mubr.f32.vlgmr.msra.gmra.mxu1 %v257_v3 }
  0x57   : > { %615 = vset.pattern.permute.xlu0 %v716_v4 }
 0x116   : > { %v253_v5 = vpop.f32.mrf.mxu0  ;;  %v324_v6 = vpop.f32.mrf.mxu1 }
 0x117   : > { %v328_v7 = vmul.f32 0.0078125, %v253_v5  ;;  %v329_v8 = vmul.f32 0.0078125, %v324_v6 }
 0x118   : > { %v529_v9 = vpop.f32.mrf.mxu0  ;;  %v564_v10 = vpop.f32.mrf.mxu1 }
 0x119   : > { %v330_v11 = vmul.f32 %v328_v7, %v328_v7  ;;  %338 = vperm.xlu0 %615, %v328_v7  }
 0x11b   : > { %v331_v12 = vsub.f32 %v329_v8, %v330_v11 }
 0x11d   : > { %v332_v13 = vadd.f32 1e-05, %v331_v12 }
 0x11f   : > { %616 = vrsqrt.f32 %v332_v13 }
 0x12c   : > { %v617_v14 = vpop.eup %616 }
 0x12d   : > { %344 = vperm.xlu0 %615, %v617_v14  }
 0x194   : > { %v339_v15 = vpop.permute.xlu0 %338 }
 0x195   : > { %v341_v16 = vsub.f32 %v186_v2, %v339_v15 }
 0x1a8   : > { %v345_v18 = vpop.permute.xlu0 %344 }
 0x1a9   : > { %v347_v19 = vmul.f32 %v345_v18, %v341_v16 }
 0x1ab   : > { %v354_v21 = vmul.f32 %v455_v17, %v347_v19 }
 0x1ad   : > { %v361_v22 = vadd.f32 %v456_v20, %v354_v21 }
 0x1af   : > { %362 = vst [vmem:[%s185_s10] sm:$0xff] %v361_v22 }
 0x1b0   : > { %659 = shalt.err (!%p656_p10)
}
 0x1b1   : > { %s660_s30 = scalar_lea.hbm %s375_s20, 128  ;;  %s664_s7 = scalar_lea.hbm %s961_s3, 256 }
 0x1b2   : > { %p661_p2 = scmp.ne.s32.totalorder %s375_s20, %s660_s30  ;;  %p665_p7 = scmp.lt.s32.totalorder %s375_s20, %s961_s3 }
 0x1b3   : > { %p666_p0 = scmp.lt.s32.totalorder %s664_s7, %s660_s30 }
 0x1b4   : > { %p662_p4 = pnand %p661_p2, %p972_p12 }
 0x1b5   : > { %p667_p6 = por %p666_p0, %p665_p7 }
 0x1b6   : > { %p663_p9 = pneg %p662_p4 }
 0x1b8   : > { %p668_p11 = pnand %p667_p6, %p663_p9 }
 0x1ba   : > { %671 = shalt.err (!%p668_p11)
}
 0x1bb   : > { %567 = dma.vmem_to_hbm [thread:$0]  (%p972_p12), %s378_s11, 128, %s375_s20, %s364_s22  }
 0x1bc PF: > { %s389_s6 = sand.u32 1, %s698_s12   ;;  %p973_p13 = scmp.ne.s32.totalorder %s967_s25, 0 }
 0x1bd   : > { %p974_p1 = scmp.ge.s32.totalorder %s710_s15, 2  ;;  %s390_s8 = scalar_lea.sflag [#allocation4], %s389_s6 }
 0x1bf   : > { %p574_p3 = pnand %p974_p1, %p973_p13 }
 0x1c1   : > { %p575_p5 = pneg %p574_p3 }
 0x1c3   : > { %693 = dma.done.wait (%p575_p5), %s390_s8, 128  }
 0x1c4   : > { %695 = vsyncadd (%p575_p5), %s390_s8, 4294967168  ;;  %p16_p8 = scmp.ge.s32.totalorder %s763_s18, 4   ;;  %s975_s12 = smov %s702_s13 }
 0x1c5   : > { %s976_s13 = smov %s706_s14  ;;  %s977_s14 = smov %s775_s21 }
 0x1c6   : > { %s978_s15 = smov %s763_s18  ;;  %18 = sbr.rel (!%p16_p8) target bundleno = 5 (0x5), region = 77 }
 0x1cb   :  { %395 = vsyncpa [#allocation3], 1 }
 0x1cc   :  { %397 = vsyncpa [#allocation3 + $0x1], 1 }
 0x1cd   :  { %398 = vsyncpa [#allocation4], 1 }
 0x1ce   :  { %400 = vsyncpa [#allocation4 + $0x1], 1 }

</bundles_post_ra>
